<compile_context>
chip_gen: v7x
topology: tpu7x:2x2x1
jax: 0.10.0
libtpu: 0.0.40
codegen_flags: <defaults>
</compile_context>

<pallas_src>
import functools

import jax
import jax.numpy as jnp
from jax.experimental import pallas as pl
from jax.experimental.pallas import tpu as pltpu


def _round_up(x, m):
    return ((x + m - 1) // m) * m


def _flash_attn_kernel(xq_ref, xkv_ref, wq_ref, wkv_ref, o_ref,
                       q_scr, m_scr, l_scr, acc_scr,
                       *, scale, d_p, tk, kv_len, masked):
    k_idx = pl.program_id(1)

    @pl.when(k_idx == 0)
    def _init():
        # Project Q once per query tile; fold the 1/sqrt(d_out) scale into Q.
        q_scr[...] = jnp.dot(xq_ref[...], wq_ref[...],
                             preferred_element_type=jnp.float32) * scale
        m_scr[...] = jnp.full_like(m_scr, -jnp.inf)
        l_scr[...] = jnp.zeros_like(l_scr)
        acc_scr[...] = jnp.zeros_like(acc_scr)

    # Fused K/V projection for this key tile: one lane-dense MXU matmul.
    kv = jnp.dot(xkv_ref[...], wkv_ref[...], preferred_element_type=jnp.float32)
    k = kv[:, :d_p]
    v = kv[:, d_p:]

    # scores = q @ k^T without materializing a transpose (contract last dims).
    s = jax.lax.dot_general(q_scr[...], k,
                            dimension_numbers=(((1,), (1,)), ((), ())),
                            preferred_element_type=jnp.float32)

    if masked:  # static: only emitted when the sequence length was padded
        key_ids = k_idx * tk + jax.lax.broadcasted_iota(jnp.int32, s.shape, 1)
        s = jnp.where(key_ids < kv_len, s, -1e30)

    # Online softmax update.
    m_prev = m_scr[...]
    m_new = jnp.maximum(m_prev, jnp.max(s, axis=-1, keepdims=True))
    alpha = jnp.exp(m_prev - m_new)
    p = jnp.exp(s - m_new)
    l_scr[...] = alpha * l_scr[...] + jnp.sum(p, axis=-1, keepdims=True)
    acc_scr[...] = alpha * acc_scr[...] + jnp.dot(
        p, v, preferred_element_type=jnp.float32)
    m_scr[...] = m_new

    @pl.when(k_idx == pl.num_programs(1) - 1)
    def _finalize():
        inv_l = pl.reciprocal(l_scr[...], approx=True)  # EUP slot, ~free
        o_ref[...] = (acc_scr[...] * inv_l).astype(o_ref.dtype)


def self_attention_v1(x, w_query, w_key, w_value, *, block=512):
    """SelfAttentionV1 forward. x: (S, d_in); weights: (d_in, d_out)."""
    S, d_in = x.shape
    d_out = w_query.shape[1]
    scale = 1.0 / float(d_out) ** 0.5

    # Pad the projection width to a lane-dense multiple of 128 so every MXU
    # matmul and every store is full-width; padded columns are zero and are
    # sliced off at the end (zero V columns -> zero context columns).
    d_p = _round_up(d_out, 128)
    pad_w = ((0, 0), (0, d_p - d_out))
    wq = jnp.pad(w_query.astype(jnp.float32), pad_w)
    wk = jnp.pad(w_key.astype(jnp.float32), pad_w)
    wv = jnp.pad(w_value.astype(jnp.float32), pad_w)
    wkv = jnp.concatenate([wk, wv], axis=1)  # (d_in, 2*d_p): fused K/V weight

    # One tile size for both grid axes (multiple of 8 sublanes); block=512 is
    # sized so double-buffered tiles fit v7x's 64 MiB VMEM as well as v5e/v6e.
    blk = min(block, _round_up(S, 8))
    s_pad = _round_up(S, blk)
    x_p = jnp.pad(x.astype(jnp.float32), ((0, s_pad - S), (0, 0)))

    grid = (s_pad // blk, s_pad // blk)

    kernel = functools.partial(
        _flash_attn_kernel,
        scale=scale, d_p=d_p, tk=blk, kv_len=S, masked=(s_pad != S))

    # Rough VMEM budget for the chosen tiles (double-buffered inputs/outputs,
    # scratch, and in-flight intermediates), with margin, clamped for v7x.
    f32 = 4
    est = f32 * (
        2 * 2 * blk * d_in                 # xq, xkv tiles (double buffered)
        + 2 * (d_in * d_p + d_in * 2 * d_p)  # resident weights (double buffered)
        + 2 * blk * d_p                    # output tile (double buffered)
        + 2 * blk * d_p + 2 * blk          # q/acc + m/l scratch
        + blk * blk + blk * 2 * d_p + 2 * blk * d_p  # scores, kv, p temps
    )
    vmem_limit = int(min(max(2 * est, 8 * 2 ** 20), 48 * 2 ** 20))

    cost = pl.CostEstimate(
        flops=2 * S * d_in * 3 * d_out + 4 * S * S * d_out,
        transcendentals=S * S,
        bytes_accessed=f32 * (S * d_in + 3 * d_in * d_out + S * d_out),
    )

    out = pl.pallas_call(
        kernel,
        out_shape=jax.ShapeDtypeStruct((s_pad, d_p), jnp.float32),
        grid_spec=pltpu.PrefetchScalarGridSpec(
            num_scalar_prefetch=0,
            grid=grid,
            in_specs=[
                pl.BlockSpec((blk, d_in), lambda i, k: (i, 0)),      # x rows -> Q tile
                pl.BlockSpec((blk, d_in), lambda i, k: (k, 0)),      # x rows -> K/V tile
                pl.BlockSpec((d_in, d_p), lambda i, k: (0, 0)),      # W_q (resident)
                pl.BlockSpec((d_in, 2 * d_p), lambda i, k: (0, 0)),  # W_kv (resident)
            ],
            out_specs=pl.BlockSpec((blk, d_p), lambda i, k: (i, 0)),
            scratch_shapes=[
                pltpu.VMEM((blk, d_p), jnp.float32),  # Q (pre-scaled)
                pltpu.VMEM((blk, 1), jnp.float32),    # running max m
                pltpu.VMEM((blk, 1), jnp.float32),    # running denom l
                pltpu.VMEM((blk, d_p), jnp.float32),  # output accumulator
            ],
        ),
        compiler_params=pltpu.CompilerParams(
            dimension_semantics=("parallel", "arbitrary"),
            vmem_limit_bytes=vmem_limit),
        cost_estimate=cost,
    )(x_p, x_p, wq, wkv)

    return out[:S, :d_out]


def self_attention_ref(x, w_query, w_key, w_value):
    k = x @ w_key
    q = x @ w_query
    v = x @ w_value
    scores = q @ k.T
    w = jax.nn.softmax(scores / jnp.sqrt(jnp.float32(k.shape[-1])), axis=-1)
    return w @ v


if __name__ == "__main__":
    key = jax.random.PRNGKey(0)

    # Small shapes consistent with the module's forward (x is 2-D: seq x d_in).
    S, d_in, d_out = 8, 32, 16
    kx, kq, kk, kv = jax.random.split(key, 4)
    x = jax.random.normal(kx, (S, d_in), dtype=jnp.float32)
    w_query = jax.random.normal(kq, (d_in, d_out), dtype=jnp.float32) * 0.1
    w_key = jax.random.normal(kk, (d_in, d_out), dtype=jnp.float32) * 0.1
    w_value = jax.random.normal(kv, (d_in, d_out), dtype=jnp.float32) * 0.1

    out = self_attention_v1(x, w_query, w_key, w_value)
    out = jax.block_until_ready(out)
    ref = self_attention_ref(x, w_query, w_key, w_value)
    assert out.shape == (S, d_out)
    assert jnp.allclose(out, ref, atol=1e-3, rtol=1e-3), float(
        jnp.max(jnp.abs(out - ref)))

    # Second check exercising the multi-tile grid + padded/masked key path.
    S2, d_in2, d_out2 = 200, 64, 32
    k2 = jax.random.split(key, 8)
    x2 = jax.random.normal(k2[4], (S2, d_in2), dtype=jnp.float32)
    wq2 = jax.random.normal(k2[5], (d_in2, d_out2), dtype=jnp.float32) * 0.1
    wk2 = jax.random.normal(k2[6], (d_in2, d_out2), dtype=jnp.float32) * 0.1
    wv2 = jax.random.normal(k2[7], (d_in2, d_out2), dtype=jnp.float32) * 0.1
    out2 = jax.block_until_ready(
        self_attention_v1(x2, wq2, wk2, wv2, block=64))
    ref2 = self_attention_ref(x2, wq2, wk2, wv2)
    assert out2.shape == (S2, d_out2)
    assert jnp.allclose(out2, ref2, atol=1e-3, rtol=1e-3), float(
        jnp.max(jnp.abs(out2 - ref2)))

    print("KERNEL_OK")
</pallas_src>

<mosaic_0001>
module attributes {stable_mosaic.version = 11 : i64} {
  func.func @_flash_attn_kernel(%arg0: i32, %arg1: i32, %arg2: memref<8x32xf32, #tpu.memory_space<vmem>>, %arg3: memref<8x32xf32, #tpu.memory_space<vmem>>, %arg4: memref<32x128xf32, #tpu.memory_space<vmem>>, %arg5: memref<32x256xf32, #tpu.memory_space<vmem>>, %arg6: memref<8x128xf32, #tpu.memory_space<vmem>>, %arg7: memref<8x128xf32, #tpu.memory_space<vmem>>, %arg8: memref<8x1xf32, #tpu.memory_space<vmem>>, %arg9: memref<8x1xf32, #tpu.memory_space<vmem>>, %arg10: memref<8x128xf32, #tpu.memory_space<vmem>>) attributes {dimension_semantics = [#tpu.dimension_semantics<parallel>, #tpu.dimension_semantics<arbitrary>], iteration_bounds = array<i64: 1, 1>, scalar_prefetch = 0 : i64, scratch_operands = 4 : i64, tpu.core_type = #tpu.core_type<tc>, window_params = [{transform_indices = @transform_0, window_bounds = array<i64: 8, 32>}, {transform_indices = @transform_1, window_bounds = array<i64: 8, 32>}, {pipeline_mode = #tpu.pipeline_mode<synchronous>, transform_indices = @transform_2, window_bounds = array<i64: 32, 128>}, {pipeline_mode = #tpu.pipeline_mode<synchronous>, transform_indices = @transform_3, window_bounds = array<i64: 32, 256>}, {transform_indices = @transform_4, window_bounds = array<i64: 8, 128>}]} {
    %c0_i32 = arith.constant 0 : i32
    %0 = arith.cmpi eq, %arg1, %c0_i32 : i32
    %1 = arith.extui %0 : i1 to i32
    %c0_i32_0 = arith.constant 0 : i32
    %2 = arith.cmpi ne, %1, %c0_i32_0 : i32
    scf.if %2 {
      %c0_24 = arith.constant 0 : index
      %c0_25 = arith.constant 0 : index
      %35 = vector.load %arg2[%c0_24, %c0_25] : memref<8x32xf32, #tpu.memory_space<vmem>>, vector<8x32xf32>
      %c0_26 = arith.constant 0 : index
      %c0_27 = arith.constant 0 : index
      %36 = vector.load %arg4[%c0_26, %c0_27] : memref<32x128xf32, #tpu.memory_space<vmem>>, vector<32x128xf32>
      %cst_28 = arith.constant dense<0.000000e+00> : vector<8x128xf32>
      %37 = tpu.matmul %35, %36, %cst_28 {dimension_numbers = #tpu.dot_dimension_numbers<[1], [0], [0], [1], [0, 0, 1, 1], [], []>} : vector<8x32xf32>, vector<32x128xf32>, vector<8x128xf32> -> vector<8x128xf32>
      %cst_29 = arith.constant 2.500000e-01 : f32
      %38 = vector.broadcast %cst_29 : f32 to vector<8x128xf32>
      %39 = arith.mulf %37, %38 : vector<8x128xf32>
      %c0_30 = arith.constant 0 : index
      %c0_31 = arith.constant 0 : index
      %40 = vector.load %arg7[%c0_30, %c0_31] : memref<8x128xf32, #tpu.memory_space<vmem>>, vector<8x128xf32>
      tpu.vector_store %arg7[%c0_30, %c0_31], %39 {strides = array<i32>} : memref<8x128xf32, #tpu.memory_space<vmem>>, vector<8x128xf32>,
      %cst_32 = arith.constant 0xFF800000 : f32
      %41 = vector.broadcast %cst_32 : f32 to vector<8x1xf32>
      %c0_33 = arith.constant 0 : index
      %c0_34 = arith.constant 0 : index
      %42 = vector.load %arg8[%c0_33, %c0_34] : memref<8x1xf32, #tpu.memory_space<vmem>>, vector<8x1xf32>
      tpu.vector_store %arg8[%c0_33, %c0_34], %41 {strides = array<i32>} : memref<8x1xf32, #tpu.memory_space<vmem>>, vector<8x1xf32>,
      %cst_35 = arith.constant 0.000000e+00 : f32
      %43 = vector.broadcast %cst_35 : f32 to vector<8x1xf32>
      %c0_36 = arith.constant 0 : index
      %c0_37 = arith.constant 0 : index
      %44 = vector.load %arg9[%c0_36, %c0_37] : memref<8x1xf32, #tpu.memory_space<vmem>>, vector<8x1xf32>
      tpu.vector_store %arg9[%c0_36, %c0_37], %43 {strides = array<i32>} : memref<8x1xf32, #tpu.memory_space<vmem>>, vector<8x1xf32>,
      %cst_38 = arith.constant 0.000000e+00 : f32
      %45 = vector.broadcast %cst_38 : f32 to vector<8x128xf32>
      %c0_39 = arith.constant 0 : index
      %c0_40 = arith.constant 0 : index
      %46 = vector.load %arg10[%c0_39, %c0_40] : memref<8x128xf32, #tpu.memory_space<vmem>>, vector<8x128xf32>
      tpu.vector_store %arg10[%c0_39, %c0_40], %45 {strides = array<i32>} : memref<8x128xf32, #tpu.memory_space<vmem>>, vector<8x128xf32>,
    } else {
    }
    %c0 = arith.constant 0 : index
    %c0_1 = arith.constant 0 : index
    %3 = vector.load %arg3[%c0, %c0_1] : memref<8x32xf32, #tpu.memory_space<vmem>>, vector<8x32xf32>
    %c0_2 = arith.constant 0 : index
    %c0_3 = arith.constant 0 : index
    %4 = vector.load %arg5[%c0_2, %c0_3] : memref<32x256xf32, #tpu.memory_space<vmem>>, vector<32x256xf32>
    %cst = arith.constant dense<0.000000e+00> : vector<8x256xf32>
    %5 = tpu.matmul %3, %4, %cst {dimension_numbers = #tpu.dot_dimension_numbers<[1], [0], [0], [1], [0, 0, 1, 1], [], []>} : vector<8x32xf32>, vector<32x256xf32>, vector<8x256xf32> -> vector<8x256xf32>
    %6 = vector.extract_strided_slice %5 {offsets = [0, 0], sizes = [8, 128], strides = [1, 1]} : vector<8x256xf32> to vector<8x128xf32>
    %7 = vector.extract_strided_slice %5 {offsets = [0, 128], sizes = [8, 128], strides = [1, 1]} : vector<8x256xf32> to vector<8x128xf32>
    %c0_4 = arith.constant 0 : index
    %c0_5 = arith.constant 0 : index
    %8 = vector.load %arg7[%c0_4, %c0_5] : memref<8x128xf32, #tpu.memory_space<vmem>>, vector<8x128xf32>
    %cst_6 = arith.constant dense<0.000000e+00> : vector<8x8xf32>
    %9 = tpu.matmul %8, %6, %cst_6 {dimension_numbers = #tpu.dot_dimension_numbers<[1], [1], [0], [0], [0, 0, 1, 0], [], []>} : vector<8x128xf32>, vector<8x128xf32>, vector<8x8xf32> -> vector<8x8xf32>
    %c0_7 = arith.constant 0 : index
    %c0_8 = arith.constant 0 : index
    %10 = vector.load %arg8[%c0_7, %c0_8] : memref<8x1xf32, #tpu.memory_space<vmem>>, vector<8x1xf32>
    %cst_9 = arith.constant dense<0xFF800000> : vector<8xf32>
    %11 = vector.multi_reduction <maximumf>, %9, %cst_9 [1] : vector<8x8xf32> to vector<8xf32>
    %12 = vector.shape_cast %11 : vector<8xf32> to vector<8x1xf32>
    %13 = arith.maximumf %10, %12 : vector<8x1xf32>
    %14 = arith.subf %10, %13 : vector<8x1xf32>
    %15 = math.exp %14 : vector<8x1xf32>
    %16 = vector.broadcast %13 : vector<8x1xf32> to vector<8x8xf32>
    %17 = arith.subf %9, %16 : vector<8x8xf32>
    %18 = math.exp %17 : vector<8x8xf32>
    %c0_10 = arith.constant 0 : index
    %c0_11 = arith.constant 0 : index
    %19 = vector.load %arg9[%c0_10, %c0_11] : memref<8x1xf32, #tpu.memory_space<vmem>>, vector<8x1xf32>
    %20 = arith.mulf %15, %19 : vector<8x1xf32>
    %cst_12 = arith.constant dense<0.000000e+00> : vector<8xf32>
    %21 = vector.multi_reduction <add>, %18, %cst_12 [1] : vector<8x8xf32> to vector<8xf32>
    %22 = vector.shape_cast %21 : vector<8xf32> to vector<8x1xf32>
    %23 = arith.addf %20, %22 : vector<8x1xf32>
    %c0_13 = arith.constant 0 : index
    %c0_14 = arith.constant 0 : index
    %24 = vector.load %arg9[%c0_13, %c0_14] : memref<8x1xf32, #tpu.memory_space<vmem>>, vector<8x1xf32>
    tpu.vector_store %arg9[%c0_13, %c0_14], %23 {strides = array<i32>} : memref<8x1xf32, #tpu.memory_space<vmem>>, vector<8x1xf32>,
    %c0_15 = arith.constant 0 : index
    %c0_16 = arith.constant 0 : index
    %25 = vector.load %arg10[%c0_15, %c0_16] : memref<8x128xf32, #tpu.memory_space<vmem>>, vector<8x128xf32>
    %26 = vector.broadcast %15 : vector<8x1xf32> to vector<8x128xf32>
    %27 = arith.mulf %26, %25 : vector<8x128xf32>
    %cst_17 = arith.constant dense<0.000000e+00> : vector<8x128xf32>
    %28 = tpu.matmul %18, %7, %cst_17 {dimension_numbers = #tpu.dot_dimension_numbers<[1], [0], [0], [1], [0, 0, 1, 1], [], []>} : vector<8x8xf32>, vector<8x128xf32>, vector<8x128xf32> -> vector<8x128xf32>
    %29 = arith.addf %27, %28 : vector<8x128xf32>
    %c0_18 = arith.constant 0 : index
    %c0_19 = arith.constant 0 : index
    %30 = vector.load %arg10[%c0_18, %c0_19] : memref<8x128xf32, #tpu.memory_space<vmem>>, vector<8x128xf32>
    tpu.vector_store %arg10[%c0_18, %c0_19], %29 {strides = array<i32>} : memref<8x128xf32, #tpu.memory_space<vmem>>, vector<8x128xf32>,
    %c0_20 = arith.constant 0 : index
    %c0_21 = arith.constant 0 : index
    %31 = vector.load %arg8[%c0_20, %c0_21] : memref<8x1xf32, #tpu.memory_space<vmem>>, vector<8x1xf32>
    tpu.vector_store %arg8[%c0_20, %c0_21], %13 {strides = array<i32>} : memref<8x1xf32, #tpu.memory_space<vmem>>, vector<8x1xf32>,
    %c0_i32_22 = arith.constant 0 : i32
    %32 = arith.cmpi eq, %arg1, %c0_i32_22 : i32
    %33 = arith.extui %32 : i1 to i32
    %c0_i32_23 = arith.constant 0 : i32
    %34 = arith.cmpi ne, %33, %c0_i32_23 : i32
    scf.if %34 {
      %c0_24 = arith.constant 0 : index
      %c0_25 = arith.constant 0 : index
      %35 = vector.load %arg9[%c0_24, %c0_25] : memref<8x1xf32, #tpu.memory_space<vmem>>, vector<8x1xf32>
      %36 = tpu.reciprocal %35 {approx = true} : vector<8x1xf32> -> vector<8x1xf32>
      %c0_26 = arith.constant 0 : index
      %c0_27 = arith.constant 0 : index
      %37 = vector.load %arg10[%c0_26, %c0_27] : memref<8x128xf32, #tpu.memory_space<vmem>>, vector<8x128xf32>
      %38 = vector.broadcast %36 : vector<8x1xf32> to vector<8x128xf32>
      %39 = arith.mulf %37, %38 : vector<8x128xf32>
      %c0_28 = arith.constant 0 : index
      %c0_29 = arith.constant 0 : index
      %40 = vector.load %arg6[%c0_28, %c0_29] : memref<8x128xf32, #tpu.memory_space<vmem>>, vector<8x128xf32>
      tpu.vector_store %arg6[%c0_28, %c0_29], %39 {strides = array<i32>} : memref<8x128xf32, #tpu.memory_space<vmem>>, vector<8x128xf32>,
    } else {
    }
    return
  }
  func.func @transform_0(%arg0: i32, %arg1: i32) -> (i32, i32) {
    %c0_i32 = arith.constant 0 : i32
    %c0_i32_0 = arith.constant 0 : i32
    return %arg0, %c0_i32 : i32, i32
  }
  func.func @transform_1(%arg0: i32, %arg1: i32) -> (i32, i32) {
    %c0_i32 = arith.constant 0 : i32
    %c0_i32_0 = arith.constant 0 : i32
    return %arg1, %c0_i32 : i32, i32
  }
  func.func @transform_2(%arg0: i32, %arg1: i32) -> (i32, i32) {
    %c0_i32 = arith.constant 0 : i32
    %c0_i32_0 = arith.constant 0 : i32
    %c0_i32_1 = arith.constant 0 : i32
    return %c0_i32, %c0_i32_0 : i32, i32
  }
  func.func @transform_3(%arg0: i32, %arg1: i32) -> (i32, i32) {
    %c0_i32 = arith.constant 0 : i32
    %c0_i32_0 = arith.constant 0 : i32
    %c0_i32_1 = arith.constant 0 : i32
    return %c0_i32, %c0_i32_0 : i32, i32
  }
  func.func @transform_4(%arg0: i32, %arg1: i32) -> (i32, i32) {
    %c0_i32 = arith.constant 0 : i32
    %c0_i32_0 = arith.constant 0 : i32
    return %arg0, %c0_i32 : i32, i32
  }
}

</mosaic_0001>

<bundles_post_ra>
// kernel: tpu_custom_call.1
= control target key start
LH: loop header
LB: loop body
LE: loop exit
PB: predicated region body
PF: predicated region fallthrough
CT: control target
= control target key end

     0   :  { %9 = vsyncpa [#allocation7], 0  ;;  %s747_s0 = inlined_call_operand.hbm [shape: f32[8,32], index: 0, kind: input, shape index: {}]   ;;  %s748_s1 = inlined_call_operand.hbm [shape: f32[8,32], index: 1, kind: input, shape index: {}]   ;;  %s749_s2 = inlined_call_operand.hbm [shape: f32[32,128], index: 2, kind: input, shape index: {}]   ;;  %s750_s3 = inlined_call_operand.hbm [shape: f32[32,256], index: 3, kind: input, shape index: {}]   ;;  %s751_s4 = inlined_call_operand.hbm [shape: f32[8,128], index: 4, kind: output, shape index: {}]  }
   0x1   :  { %10 = vsyncpa [#allocation10], 0 }
   0x2   :  { %11 = vsyncpa [#allocation13], 0 }
   0x3   :  { %12 = vsyncpa [#allocation8], 0  ;;  %s638_s15 = smov [#allocation9]   ;;  %s639_s17 = smov [#allocation6]  }
   0x4   :  { %s29_s16 = sshll.u32 %s638_s15, 4  ;;  %s19_s18 = sshll.u32 %s639_s17, 4  ;;  %s30_s16 = int_to_ptr.vmem [resolvable:$true] %s29_s16  ;;  %s20_s18 = int_to_ptr.vmem [resolvable:$true] %s19_s18 }
   0x5   :  { %s520_s21 = scalar_lea.hbm %s748_s1, 128 }
   0x6   :  { %p521_p0 = scmp.ne.s32.totalorder %s748_s1, %s520_s21  ;;  %p524_p1 = scmp.lt.u32.totalorder %s520_s21, %s748_s1 }
   0x8   :  { %p526_p2 = pnand %p524_p1, %p521_p0 }
   0xa   :  { %529 = shalt.err (!%p526_p2)
}
   0xb   :  { %s530_s26 = scalar_lea.vmem %s30_s16, 128  ;;  %p535_p4 = scmp.lt.s32.totalorder %s30_s16, %s30_s16 }
   0xc   :  { %p531_p3 = scmp.ne.s32.totalorder %s30_s16, %s530_s26  ;;  %p536_p5 = scmp.lt.s32.totalorder %s530_s26, %s530_s26 }
   0xe   :  { %p537_p6 = por %p536_p5, %p535_p4 }
  0x10   :  { %p538_p7 = pnand %p537_p6, %p531_p3 }
  0x12   :  { %541 = shalt.err (!%p538_p7)
}
  0x13   :  { %32 = dma.hbm_to_vmem [thread:$0]  %s748_s1, 128, %s30_s16, [#allocation10]  }
  0x14   :  { %s542_s5 = scalar_lea.hbm %s747_s0, 128 }
  0x15   :  { %p543_p8 = scmp.ne.s32.totalorder %s747_s0, %s542_s5  ;;  %p546_p9 = scmp.lt.u32.totalorder %s542_s5, %s747_s0 }
  0x17   :  { %p548_p10 = pnand %p546_p9, %p543_p8 }
  0x19   :  { %551 = shalt.err (!%p548_p10)
}
  0x1a   :  { %s552_s10 = scalar_lea.vmem %s20_s18, 128  ;;  %p557_p12 = scmp.lt.s32.totalorder %s20_s18, %s20_s18 }
  0x1b   :  { %p553_p11 = scmp.ne.s32.totalorder %s20_s18, %s552_s10  ;;  %p558_p13 = scmp.lt.s32.totalorder %s552_s10, %s552_s10 }
  0x1d   :  { %p559_p0 = por %p558_p13, %p557_p12 }
  0x1f   :  { %p560_p1 = pnand %p559_p0, %p553_p11 }
  0x21   :  { %563 = shalt.err (!%p560_p1)
}
  0x22   :  { %22 = dma.hbm_to_vmem [thread:$0]  %s747_s0, 128, %s20_s18, [#allocation7]  }
  0x23   :  { %s640_s12 = smov [#allocation11]   ;;  %s564_s16 = scalar_lea.hbm %s749_s2, 512 }
  0x24   :  { %s38_s13 = sshll.u32 %s640_s12, 4  ;;  %p565_p2 = scmp.ne.s32.totalorder %s749_s2, %s564_s16  ;;  %s39_s13 = int_to_ptr.vmem [resolvable:$true] %s38_s13 }
  0x25   :  { %p568_p3 = scmp.lt.u32.totalorder %s564_s16, %s749_s2 }
  0x27   :  { %p570_p4 = pnand %p568_p3, %p565_p2 }
  0x29   :  { %573 = shalt.err (!%p570_p4)
}
  0x2a   :  { %s574_s22 = scalar_lea.vmem %s39_s13, 512  ;;  %p579_p6 = scmp.lt.s32.totalorder %s39_s13, %s39_s13 }
  0x2b   :  { %p575_p5 = scmp.ne.s32.totalorder %s39_s13, %s574_s22  ;;  %p580_p7 = scmp.lt.s32.totalorder %s574_s22, %s574_s22 }
  0x2d   :  { %p581_p8 = por %p580_p7, %p579_p6 }
  0x2f   :  { %p582_p9 = pnand %p581_p8, %p575_p5 }
  0x31   :  { %585 = shalt.err (!%p582_p9)
}
  0x32   :  { %s641_s0 = smov 128   ;;  %s642_s18 = smov 8  }
  0x33   :  { %44 = dma.hbm_to_vmem [thread:$0]  %s749_s2, 512, %s39_s13, [#allocation10], %s641_s0, %s641_s0, %s642_s18  }
  0x34   :  { %s643_s25 = smov [#allocation12]   ;;  %s586_s29 = scalar_lea.hbm %s750_s3, 1024 }
  0x35   :  { %s50_s26 = sshll.u32 %s643_s25, 4  ;;  %p587_p10 = scmp.ne.s32.totalorder %s750_s3, %s586_s29  ;;  %s51_s26 = int_to_ptr.vmem [resolvable:$true] %s50_s26 }
  0x36   :  { %p590_p11 = scmp.lt.u32.totalorder %s586_s29, %s750_s3 }
  0x38   :  { %p592_p12 = pnand %p590_p11, %p587_p10 }
  0x3a   :  { %595 = shalt.err (!%p592_p12)
}
  0x3b   :  { %s596_s8 = scalar_lea.vmem %s51_s26, 1024  ;;  %p601_p0 = scmp.lt.s32.totalorder %s51_s26, %s51_s26 }
  0x3c   :  { %p597_p13 = scmp.ne.s32.totalorder %s51_s26, %s596_s8  ;;  %p602_p1 = scmp.lt.s32.totalorder %s596_s8, %s596_s8 }
  0x3e   :  { %p603_p2 = por %p602_p1, %p601_p0 }
  0x40   :  { %p604_p3 = pnand %p603_p2, %p597_p13 }
  0x42   :  { %607 = shalt.err (!%p604_p3)
}
  0x43   :  { %s644_s2 = smov 256   ;;  %s645_s9 = smov 16  }
  0x44   :  { %56 = dma.hbm_to_vmem [thread:$0]  %s750_s3, 1024, %s51_s26, [#allocation13], %s644_s2, %s644_s2, %s645_s9  }
  0x45   :  { %630 = dma.done.wait [#allocation7], 128  }
  0x46   :  { %631 = vsyncadd [#allocation7], 4294967168 }
  0x47   :  { %632 = dma.done.wait [#allocation10], 640  }
  0x48   :  { %633 = vsyncadd [#allocation10], 4294966656 }
  0x49   :  { %634 = dma.done.wait [#allocation13], 1024  }
  0x4a   :  { %635 = vsyncadd [#allocation13], 4294966272  ;;  %v646_v0 = vmov 0.0|0.0   ;;  %v647_v1 = vmov 0.0   ;;  %vm648_vm0 = vmmov 0   ;;  %v160_v2 = vld [vmem:[#allocation12 + $0x8] sm:$0xff] }
  0x4b   :  { %484 = vmatprep.subr.bf16.mxu0 %v646_v0  ;;  %235 = vmatprep.mubr.f32.mxu1 %v647_v1  ;;  %v162_v3 = vld [vmem:[#allocation12 + $0x18] sm:$0xff]  ;;  %v159_v4 = vld [vmem:[#allocation12] sm:$0xff]  ;;  %v161_v6 = vld [vmem:[#allocation12 + $0x10] sm:$0xff]  ;;  %vm78_vm1 = vcmask 261120   ;;  %vm154_vm2 = vcmask 7168   ;;  %v649_v27 = vmov -inf  }
  0x4c   :  { %471 = vmatprep.mubr.msk.f32.mxu0 %vm648_vm0, %v647_v1  ;;  %v490_v5 = vpack.c.bf16 %v162_v3, %v160_v2  ;;  %v74_v7 = vld [vmem:[#allocation11] sm:$0xff]  ;;  %v75_v8 = vld [vmem:[#allocation11 + $0x8] sm:$0xff]  ;;  %v492_v9 = vpack.c.bf16 %v161_v6, %v159_v4  ;;  %v166_v12 = vld [vmem:[#allocation12 + $0x38] sm:$0xff]  ;;  %155 = vst.msk [vmem:[#allocation3] sm:$0xff] %vm154_vm2, %v649_v27  ;;  %vm314_vm3 = vcmask 64512   ;;  %v650_v31 = vmov 0  }
  0x4d   :  { %v485_v10 = vpack.c.bf16 %v75_v8, %v74_v7  ;;  %v164_v11 = vld [vmem:[#allocation12 + $0x28] sm:$0xff]  ;;  %v163_v13 = vld [vmem:[#allocation12 + $0x20] sm:$0xff]  ;;  %v165_v15 = vld [vmem:[#allocation12 + $0x30] sm:$0xff]  ;;  %156 = vst.msk [vmem:[#allocation4] sm:$0xff] %vm154_vm2, %v647_v1  ;;  %512 = vset.pattern.permute.xlu0 %v650_v31  ;;  %513 = vset.pattern.permute.xlu1 %v650_v31  ;;  %s651_s3 = smov [#allocation14]  }
  0x4e   :  { %491 = vmatprep.subr.bf16.mxu1 %v490_v5  ;;  %v494_v14 = vpack.c.bf16 %v166_v12, %v164_v11  ;;  %v76_v16 = vld [vmem:[#allocation11 + $0x10] sm:$0xff]  ;;  %v77_v17 = vld [vmem:[#allocation11 + $0x18] sm:$0xff]  ;;  %v496_v18 = vpack.c.bf16 %v165_v15, %v163_v13  ;;  %s440_s11 = sshll.u32 %s651_s3, 4  ;;  %s441_s11 = int_to_ptr.vmem [resolvable:$true] %s440_s11 }
  0x4f   :  { %493 = vmatpush1.bf16.msra.mxu1 %v492_v9  ;;  %486 = vmatpush3.bf16.msra.mxu0 %v485_v10  ;;  %v488_v19 = vpack.c.bf16 %v77_v17, %v76_v16  ;;  %v158_v20 = vld [vmem:[#allocation9] sm:$0xff]  ;;  %v73_v21 = vld [vmem:[#allocation6] sm:$0xff]  ;;  %s608_s12 = scalar_lea.vmem %s441_s11, 128  ;;  %p613_p5 = scmp.lt.s32.totalorder %s441_s11, %s441_s11 }
  0x50   :  { %495 = vmatprep.subr.bf16.mxu1 %v494_v14  ;;  %487 = vmatprep.subr.bf16.mxu0 %v646_v0  ;;  %p609_p4 = scmp.ne.s32.totalorder %s441_s11, %s608_s12  ;;  %p614_p6 = scmp.lt.s32.totalorder %s608_s12, %s608_s12 }
  0x52   :  { %p615_p7 = por %p614_p6, %p613_p5 }
  0x53   :  { %497 = vmatpush1.bf16.msra.mxu1 %v496_v18  ;;  %489 = vmatpush3.bf16.msra.mxu0 %v488_v19  ;;  %v313_v32 = vld [vmem:[#allocation3] sm:$0xff] }
  0x54   :  { %474 = vmatprep.subr.mxu0 %v647_v1  ;;  %479 = vmatprep.subr.mxu1 %v647_v1  ;;  %v330_v43 = vld [vmem:[#allocation4] sm:$0xff]  ;;  %p616_p8 = pnand %p615_p7, %p609_p4 }
  0x56   :  { %452 = vmatmul.mubr.msk.f32.vlgmr.msra.gmra.mrb[0].mxu1 %vm78_vm1, %v158_v20  ;;  %472 = vmatmul.mubr.msk.f32.vlgmr.msra.gmra.mrb[0].mxu0 %vm78_vm1, %v73_v21 }
  0x57   :  { %476 = vmatprep.mubr.msk.f32.mxu0 %vm648_vm0, %v647_v1  ;;  %481 = vmatprep.mubr.msk.f32.mxu1 %vm648_vm0, %v647_v1 }
 0x129   :  { %v237_v22 = vpop.f32.mrb[0].mxu1  ;;  %v148_v23 = vpop.f32.mrb[0].mxu0 }
 0x12a   :  { %v152_v24 = vmul.f32 0.25, %v148_v23  ;;  %v239_v25 = vpop.f32.mrb[1].mxu1  ;;  %475 = vmatpush3.xpose.msra.mxu0 %v237_v22  ;;  %v473_v26 = vpop.f32.mrb[1].mxu0 }
 0x12b   :  { %480 = vmatpush3.msra.mxu1 %v239_v25 }
 0x12d   :  { %477 = vmatmul.mubr.f32.vlgmr.msra.gmra.mrb[2].mxu0 %v152_v24 }
 0x200   :  { %v309_v28 = vpop.f32.mrb[2].mxu0 }
 0x201   :  { %v478_v29 = vpop.f32.mrb[3].mxu0  ;;  %v315_v30 = vsel %vm314_vm3, %v309_v28, -inf }
 0x202   :  { %316 = vmax.xlane.f32.xlu0 %v315_v30 }
 0x28f   :  { %v317_v33 = vpop.xlane.xlu0 %316 }
 0x290   :  { %v318_v34 = vmax.f32 %v313_v32, %v317_v33 }
 0x292   :  { %v319_v35 = vsub.f32 %v313_v32, %v318_v34  ;;  %420 = vst.msk [vmem:[#allocation3] sm:$0xff] %vm154_vm2, %v318_v34  ;;  %324 = vperm.xlu0 %512, %v318_v34  }
 0x294   :  { %v320_v41 = vmul.f32 1.442695, %v319_v35 }
 0x311   :  { %v325_v36 = vpop.permute.xlu0 %324 }
 0x312   :  { %v327_v37 = vsub.f32 %v309_v28, %v325_v36 }
 0x314   :  { %v328_v38 = vmul.f32 1.442695, %v327_v37 }
 0x316   :  { %514 = vpow2.f32 %v328_v38 }
 0x317   :  { %516 = vpow2.f32 %v320_v41 }
 0x320   :  { %v515_v39 = vpop.eup %514 }
 0x321   :  { %482 = vmatmul.mubr.msk.f32.vlgmr.msra.gmra.mrb[2].mxu1 %vm314_vm3, %v515_v39  ;;  %v332_v40 = vsel %vm314_vm3, %v515_v39, 0.0  ;;  %v517_v42 = vpop.eup %516 }
 0x322   :  { %333 = vadd.xlane.f32.xlu1 %v332_v40  ;;  %v331_v44 = vmul.f32 %v517_v42, %v330_v43 }
 0x333   :  { %341 = vperm.xlu1 %513, %v517_v42  }
 0x3af   :  { %v334_v45 = vpop.xlane.xlu1 %333 }
 0x3b0   :  { %v335_v46 = vadd.f32 %v334_v45, %v331_v44 }
 0x3b2   :  { %337 = vst.msk [vmem:[#allocation4] sm:$0xff] %vm154_vm2, %v335_v46 }
 0x3b3   :  { %v342_v51 = vpop.permute.xlu1 %341 }
 0x3b4   :  { %v344_v52 = vmul.f32 0.0, %v342_v51 }
 0x3b9   :  { %v424_v47 = vld [vmem:[#allocation4] sm:$0xff] }
 0x3ba   :  { %518 = vrcp.f32 %v424_v47 }
 0x3c4   :  { %v519_v48 = vpop.eup %518 }
 0x3c5   :  { %429 = vperm.xlu1 %513, %v519_v48  }
 0x3f4   :  { %v414_v49 = vpop.f32.mrb[2].mxu1 }
 0x3f5   :  { %v483_v50 = vpop.f32.mrb[3].mxu1  ;;  %v418_v53 = vadd.f32 %v414_v49, %v344_v52 }
 0x444   :  { %v430_v54 = vpop.permute.xlu1 %429 }
 0x445   :  { %v432_v55 = vmul.f32 %v430_v54, %v418_v53 }
 0x447   :  { %433 = vst [vmem:[#allocation14] sm:$0xff] %v432_v55 }
 0x448   :  { %619 = shalt.err (!%p616_p8)
}
 0x449   :  { %s620_s15 = scalar_lea.hbm %s751_s4, 128 }
 0x44a   :  { %p621_p9 = scmp.ne.s32.totalorder %s751_s4, %s620_s15  ;;  %p624_p10 = scmp.lt.u32.totalorder %s620_s15, %s751_s4 }
 0x44c   :  { %p626_p11 = pnand %p624_p10, %p621_p9 }
 0x44e   :  { %629 = shalt.err (!%p626_p11)
}
 0x44f   :  { %443 = dma.vmem_to_hbm [thread:$0]  %s441_s11, 128, %s751_s4, [#allocation8]  }
 0x450   :  { %636 = dma.done.wait [#allocation8], 128  }
 0x451   :  { %637 = vsyncadd [#allocation8], 4294967168 }
 0x452   :  { %447 = vsyncpa [#allocation7], 1 }
 0x453   :  { %448 = vsyncpa [#allocation10], 1 }
 0x454   :  { %449 = vsyncpa [#allocation13], 1 }
 0x455   :  { %450 = vsyncpa [#allocation8], 1 }

</bundles_post_ra>
